<compile_context>
chip_gen: v5e
topology: v5e:2x2
jax: 0.10.0
libtpu: 0.0.40
codegen_flags: <defaults>
</compile_context>

<pallas_src>
import functools
import numpy as np
import jax
import jax.numpy as jnp
from jax.experimental import pallas as pl
from jax.experimental.pallas import tpu as pltpu

_MiB = 1024 * 1024


def _vmem_budget():
    """Generation-aware VMEM sizing.

    Returns (working_set_budget_bytes, vmem_limit_bytes, two_tensorcores).
    v5e/v6e: 128 MiB physical VMEM per chip; v7x: 64 MiB per TensorCore and
    2 TensorCores per chip.
    """
    vmem_bytes = None
    try:
        vmem_bytes = int(pltpu.get_tpu_info().vmem_capacity_bytes)
    except Exception:
        vmem_bytes = None

    kind = ""
    try:
        kind = jax.devices()[0].device_kind.lower()
    except Exception:
        kind = ""
    is_v7 = ("v7" in kind) or ("7x" in kind)

    if vmem_bytes is None:
        vmem_bytes = (64 if is_v7 else 128) * _MiB

    # Leave headroom below physical for compiler-internal scratch / semaphores,
    # and size the tile-search budget below the requested limit.
    vmem_limit = min(vmem_bytes - 8 * _MiB, 100 * _MiB)
    vmem_limit = max(vmem_limit, 16 * _MiB)
    budget = max(int(vmem_limit * 0.85), 12 * _MiB)   # ~48 MiB on v7x, ~85 MiB on v5e/v6e
    return budget, vmem_limit, is_v7


def _attn_kernel(*refs, scale, has_mask, with_att, single_kt):
    idx = 0
    q_ref = refs[idx]; idx += 1
    k_ref = refs[idx]; idx += 1
    v_ref = refs[idx]; idx += 1
    m_ref = None
    if has_mask:
        m_ref = refs[idx]; idx += 1
    out_ref = refs[idx]; idx += 1
    att_ref = None
    if with_att:
        att_ref = refs[idx]; idx += 1
    acc_ref = None
    if not single_kt:
        acc_ref = refs[idx]; idx += 1

    # scores = q @ k^T  (MXU, native-dtype inputs, f32 accumulate)
    scores = jnp.einsum("bqd,bkd->bqk", q_ref[...], k_ref[...],
                        preferred_element_type=jnp.float32)    # (BB, Lq, TK)

    if scale != 1.0:
        # Scale the f32 logits once per tile (matches the reference which
        # divides f32 logits by sqrt(input_dim); no per-kt q re-scaling).
        scores = scores * scale

    if m_ref is not None:
        # masked_fill_(mask, -inf); fully-masked columns yield NaN, matching
        # the PyTorch masked_fill(-inf) + Softmax(1) behavior.
        scores = jnp.where(m_ref[...] != 0, -jnp.inf, scores)

    # softmax over the *query* axis (dim=1), matching nn.Softmax(1).
    # Per-column softmax => Lk tiles are independent; no online softmax.
    m = jnp.max(scores, axis=1, keepdims=True)            # (BB, 1, TK)
    e = jnp.exp(scores - m)
    denom = jnp.sum(e, axis=1, keepdims=True)              # (BB, 1, TK)
    # approx=False -> precise divide; keeps the 1e-5 tolerance and denom is
    # only (BB, 1, TK) so the cost is negligible.
    att_f32 = e * pl.reciprocal(denom, approx=False)

    # dropout(p=0.0) is identity -> skipped.

    # Cast once; reuse for both the MXU input and the att writeback when the
    # dtypes agree (the common case).
    att_mxu = att_f32.astype(v_ref.dtype)
    if att_ref is not None:
        if att_ref.dtype == v_ref.dtype:
            att_ref[...] = att_mxu
        else:
            att_ref[...] = att_f32.astype(att_ref.dtype)

    pv = jnp.einsum("bqk,bkd->bqd", att_mxu, v_ref[...],
                    preferred_element_type=jnp.float32)    # (BB, Lq, Dv)

    if single_kt:
        # Single Lk tile: no accumulator scratch, no init/finalize.
        out_ref[...] = pv.astype(out_ref.dtype)
    else:
        kt = pl.program_id(1)

        @pl.when(kt == 0)
        def _init():
            acc_ref[...] = jnp.zeros_like(acc_ref)

        acc_ref[...] += pv

        @pl.when(kt == pl.num_programs(1) - 1)
        def _finalize():
            out_ref[...] = acc_ref[...].astype(out_ref.dtype)


def _choose_tiles(B, Lq, Lk, D, Dv, itemsize, has_mask, with_att,
                  budget, max_bb):
    """Pick (batch block BB, Lk tile TK) so the double-buffered working set
    fits the generation-aware VMEM budget. BB is additionally capped by
    max_bb (v7x: B//2 so both TensorCores get a share of the parallel axis)."""

    def working_set(bb, tk):
        blk = bb * (Lq * D + tk * D + tk * Dv + Lq * Dv) * itemsize
        if with_att:
            blk += bb * Lq * tk * itemsize          # att writeback block
        if has_mask:
            blk += bb * Lq * tk                     # int8 mask block
        blk *= 2                                    # double-buffered pipeline
        if tk != Lk:
            blk += bb * Lq * Dv * 4                 # f32 accumulator scratch
        blk += (3 * bb * Lq * tk * 4) // 2          # f32 softmax temps (partially fused)
        return blk

    # TK must equal Lk (full) or be a multiple of 128 dividing Lk
    # (BlockSpec (8,128) constraint + lane-dense att/mask blocks).
    tk_candidates = [Lk]
    if Lk % 128 == 0:
        tk_candidates += [t for t in (8192, 4096, 2048, 1024, 512, 256, 128)
                          if t < Lk and Lk % t == 0]

    bb_candidates = [b for b in range(max(1, min(B, max_bb)), 0, -1)
                     if B % b == 0]

    for tk in tk_candidates:            # prefer fewest Lk steps
        for bb in bb_candidates:        # then most batches per step
            if working_set(bb, tk) <= budget:
                return bb, tk
    # Fallback (e.g. huge Lk not divisible by 128): smallest legal tile.
    return 1, tk_candidates[-1]


def attention_layer(query, key, value, att_mask=None, input_dim=1,
                    return_att_weights=True):
    """Pallas equivalent of AttentionLayer.forward (att_dropout=0.0).

    query: (B, Lq, D), key: (B, Lk, D), value: (B, Lk, Dv)
    att_mask: optional bool/int (B, Lq, Lk); True/nonzero entries are masked
              with -inf before the softmax (over dim=1).
    Returns (output (B, Lq, Dv), att_weights (B, Lq, Lk)) or just output
    when return_att_weights=False (skips the Lq*Lk HBM writeback).
    """
    B, Lq, D = query.shape
    Bk, Lk, Dk = key.shape
    Bv, Lv, Dv = value.shape
    assert B == Bk == Bv and D == Dk and Lk == Lv

    has_mask = att_mask is not None
    if has_mask:
        assert att_mask.shape == (B, Lq, Lk), (
            f"Attention mask shape {att_mask.shape} mismatch with Attention "
            f"logit tensor shape {(B, Lq, Lk)}.")
        mask = att_mask.astype(jnp.int8)

    scale = float(1.0 / np.sqrt(input_dim))

    budget, vmem_limit, two_tc = _vmem_budget()
    # v7x has 2 TensorCores: keep the parallel (batch) grid axis >= 2.
    max_bb = B // 2 if (two_tc and B >= 2) else B

    itemsize = jnp.dtype(query.dtype).itemsize
    BB, TK = _choose_tiles(B, Lq, Lk, D, Dv, itemsize, has_mask,
                           return_att_weights, budget, max_bb)
    single_kt = (TK == Lk)

    kernel = functools.partial(_attn_kernel, scale=scale, has_mask=has_mask,
                               with_att=return_att_weights,
                               single_kt=single_kt)

    if single_kt:
        grid = (B // BB,)
        qmap = lambda b: (b, 0, 0)
        kvmap = lambda b: (b, 0, 0)
        outmap = lambda b: (b, 0, 0)
        attmap = lambda b: (b, 0, 0)
        maskmap = lambda b: (b, 0, 0)
        scratch = []
        semantics = ("parallel",)
    else:
        grid = (B // BB, Lk // TK)
        qmap = lambda b, kt: (b, 0, 0)
        kvmap = lambda b, kt: (b, kt, 0)
        outmap = lambda b, kt: (b, 0, 0)
        attmap = lambda b, kt: (b, 0, kt)
        maskmap = lambda b, kt: (b, 0, kt)
        scratch = [pltpu.VMEM((BB, Lq, Dv), jnp.float32)]
        semantics = ("parallel", "arbitrary")

    in_specs = [
        pl.BlockSpec((BB, Lq, D), qmap),      # q (kt-invariant)
        pl.BlockSpec((BB, TK, D), kvmap),     # k tile
        pl.BlockSpec((BB, TK, Dv), kvmap),    # v tile
    ]
    inputs = [query, key, value]
    if has_mask:
        in_specs.append(pl.BlockSpec((BB, Lq, TK), maskmap))
        inputs.append(mask)

    out_shapes = [jax.ShapeDtypeStruct((B, Lq, Dv), query.dtype)]
    out_specs = [pl.BlockSpec((BB, Lq, Dv), outmap)]
    if return_att_weights:
        out_shapes.append(jax.ShapeDtypeStruct((B, Lq, Lk), query.dtype))
        out_specs.append(pl.BlockSpec((BB, Lq, TK), attmap))

    grid_spec = pltpu.PrefetchScalarGridSpec(
        num_scalar_prefetch=0,
        grid=grid,
        in_specs=in_specs,
        out_specs=out_specs,
        scratch_shapes=scratch,
    )

    results = pl.pallas_call(
        kernel,
        out_shape=tuple(out_shapes),
        grid_spec=grid_spec,
        compiler_params=pltpu.CompilerParams(
            dimension_semantics=semantics,
            vmem_limit_bytes=int(vmem_limit)),
    )(*inputs)

    if return_att_weights:
        output, att_weights = results
        return output, att_weights
    (output,) = results
    return output


def _reference(query, key, value, att_mask=None, input_dim=1):
    """Pure-JAX reference reproducing the PyTorch forward exactly."""
    scores = jnp.einsum("bqd,bkd->bqk", query, key) / np.sqrt(input_dim)
    if att_mask is not None:
        scores = jnp.where(att_mask, -jnp.inf, scores)
    att = jax.nn.softmax(scores, axis=1)   # nn.Softmax(1)
    out = jnp.einsum("bqk,bkd->bqd", att, value)
    return out, att


if __name__ == "__main__":
    key0 = jax.random.PRNGKey(0)
    kq, kk, kv, km = jax.random.split(key0, 4)

    B, Lq, Lk, D, Dv = 2, 8, 8, 32, 32
    q = jax.random.normal(kq, (B, Lq, D), dtype=jnp.float32)
    k = jax.random.normal(kk, (B, Lk, D), dtype=jnp.float32)
    v = jax.random.normal(kv, (B, Lk, Dv), dtype=jnp.float32)

    # --- no-mask path (input_dim=1, scale is identity) ---
    out, att = attention_layer(q, k, v, att_mask=None, input_dim=1)
    jax.block_until_ready(out)
    jax.block_until_ready(att)
    ref_out, ref_att = _reference(q, k, v, att_mask=None, input_dim=1)
    np.testing.assert_allclose(np.asarray(out), np.asarray(ref_out),
                               rtol=1e-5, atol=1e-5)
    np.testing.assert_allclose(np.asarray(att), np.asarray(ref_att),
                               rtol=1e-5, atol=1e-5)

    # --- masked path with scaling (input_dim=D) ---
    mask = jax.random.uniform(km, (B, Lq, Lk)) > 0.7
    mask = mask.at[:, 0, :].set(False)   # keep every column partially unmasked
    out_m, att_m = attention_layer(q, k, v, att_mask=mask, input_dim=D)
    jax.block_until_ready(out_m)
    ref_out_m, ref_att_m = _reference(q, k, v, att_mask=mask, input_dim=D)
    np.testing.assert_allclose(np.asarray(out_m), np.asarray(ref_out_m),
                               rtol=1e-5, atol=1e-5)
    np.testing.assert_allclose(np.asarray(att_m), np.asarray(ref_att_m),
                               rtol=1e-5, atol=1e-5)

    # --- output-only variant (skips the Lq*Lk writeback) ---
    out_only = attention_layer(q, k, v, att_mask=None, input_dim=1,
                               return_att_weights=False)
    jax.block_until_ready(out_only)
    np.testing.assert_allclose(np.asarray(out_only), np.asarray(ref_out),
                               rtol=1e-5, atol=1e-5)

    print("KERNEL_OK")
</pallas_src>

<mosaic_0001>
module attributes {stable_mosaic.version = 11 : i64} {
  func.func @_attn_kernel(%arg0: i32, %arg1: memref<2x8x32xf32, #tpu.memory_space<vmem>>, %arg2: memref<2x8x32xf32, #tpu.memory_space<vmem>>, %arg3: memref<2x8x32xf32, #tpu.memory_space<vmem>>, %arg4: memref<2x8x32xf32, #tpu.memory_space<vmem>>, %arg5: memref<2x8x8xf32, #tpu.memory_space<vmem>>) attributes {dimension_semantics = [#tpu.dimension_semantics<parallel>], iteration_bounds = array<i64: 1>, scalar_prefetch = 0 : i64, scratch_operands = 0 : i64, tpu.core_type = #tpu.core_type<tc>, window_params = [{transform_indices = @transform_0, window_bounds = array<i64: 2, 8, 32>}, {transform_indices = @transform_1, window_bounds = array<i64: 2, 8, 32>}, {transform_indices = @transform_2, window_bounds = array<i64: 2, 8, 32>}, {transform_indices = @transform_3, window_bounds = array<i64: 2, 8, 32>}, {transform_indices = @transform_4, window_bounds = array<i64: 2, 8, 8>}]} {
    %c0 = arith.constant 0 : index
    %c0_0 = arith.constant 0 : index
    %c0_1 = arith.constant 0 : index
    %0 = vector.load %arg1[%c0, %c0_0, %c0_1] : memref<2x8x32xf32, #tpu.memory_space<vmem>>, vector<2x8x32xf32>
    %c0_2 = arith.constant 0 : index
    %c0_3 = arith.constant 0 : index
    %c0_4 = arith.constant 0 : index
    %1 = vector.load %arg2[%c0_2, %c0_3, %c0_4] : memref<2x8x32xf32, #tpu.memory_space<vmem>>, vector<2x8x32xf32>
    "tpu.trace_start"() <{level = 10 : i32, message = "bqd,bkd->bqk"}> : () -> ()
    %cst = arith.constant dense<0.000000e+00> : vector<2x8x8xf32>
    %2 = tpu.matmul %0, %1, %cst {dimension_numbers = #tpu.dot_dimension_numbers<[2], [2], [1], [1], [0, 0, 0, 1, 1, 1], [0], [0]>} : vector<2x8x32xf32>, vector<2x8x32xf32>, vector<2x8x8xf32> -> vector<2x8x8xf32>
    "tpu.trace_stop"() : () -> ()
    %cst_5 = arith.constant dense<0xFF800000> : vector<2x8xf32>
    %3 = vector.multi_reduction <maximumf>, %2, %cst_5 [1] : vector<2x8x8xf32> to vector<2x8xf32>
    %4 = vector.shape_cast %3 : vector<2x8xf32> to vector<2x1x8xf32>
    %5 = vector.broadcast %4 : vector<2x1x8xf32> to vector<2x8x8xf32>
    %6 = arith.subf %2, %5 : vector<2x8x8xf32>
    %7 = math.exp %6 : vector<2x8x8xf32>
    %cst_6 = arith.constant dense<0.000000e+00> : vector<2x8xf32>
    %8 = vector.multi_reduction <add>, %7, %cst_6 [1] : vector<2x8x8xf32> to vector<2x8xf32>
    %9 = vector.shape_cast %8 : vector<2x8xf32> to vector<2x1x8xf32>
    %10 = tpu.reciprocal %9 : vector<2x1x8xf32> -> vector<2x1x8xf32>
    %11 = vector.broadcast %10 : vector<2x1x8xf32> to vector<2x8x8xf32>
    %12 = arith.mulf %7, %11 : vector<2x8x8xf32>
    %c0_7 = arith.constant 0 : index
    %c0_8 = arith.constant 0 : index
    %c0_9 = arith.constant 0 : index
    %13 = vector.load %arg5[%c0_7, %c0_8, %c0_9] : memref<2x8x8xf32, #tpu.memory_space<vmem>>, vector<2x8x8xf32>
    tpu.vector_store %arg5[%c0_7, %c0_8, %c0_9], %12 {strides = array<i32>} : memref<2x8x8xf32, #tpu.memory_space<vmem>>, vector<2x8x8xf32>,
    %c0_10 = arith.constant 0 : index
    %c0_11 = arith.constant 0 : index
    %c0_12 = arith.constant 0 : index
    %14 = vector.load %arg3[%c0_10, %c0_11, %c0_12] : memref<2x8x32xf32, #tpu.memory_space<vmem>>, vector<2x8x32xf32>
    "tpu.trace_start"() <{level = 10 : i32, message = "bqk,bkd->bqd"}> : () -> ()
    %cst_13 = arith.constant dense<0.000000e+00> : vector<2x8x32xf32>
    %15 = tpu.matmul %12, %14, %cst_13 {dimension_numbers = #tpu.dot_dimension_numbers<[2], [1], [1], [2], [0, 0, 0, 1, 1, 2], [0], [0]>} : vector<2x8x8xf32>, vector<2x8x32xf32>, vector<2x8x32xf32> -> vector<2x8x32xf32>
    "tpu.trace_stop"() : () -> ()
    %c0_14 = arith.constant 0 : index
    %c0_15 = arith.constant 0 : index
    %c0_16 = arith.constant 0 : index
    %16 = vector.load %arg4[%c0_14, %c0_15, %c0_16] : memref<2x8x32xf32, #tpu.memory_space<vmem>>, vector<2x8x32xf32>
    tpu.vector_store %arg4[%c0_14, %c0_15, %c0_16], %15 {strides = array<i32>} : memref<2x8x32xf32, #tpu.memory_space<vmem>>, vector<2x8x32xf32>,
    return
  }
  func.func @transform_0(%arg0: i32) -> (i32, i32, i32) {
    %c0_i32 = arith.constant 0 : i32
    %c0_i32_0 = arith.constant 0 : i32
    %c0_i32_1 = arith.constant 0 : i32
    return %arg0, %c0_i32, %c0_i32_0 : i32, i32, i32
  }
  func.func @transform_1(%arg0: i32) -> (i32, i32, i32) {
    %c0_i32 = arith.constant 0 : i32
    %c0_i32_0 = arith.constant 0 : i32
    %c0_i32_1 = arith.constant 0 : i32
    return %arg0, %c0_i32, %c0_i32_0 : i32, i32, i32
  }
  func.func @transform_2(%arg0: i32) -> (i32, i32, i32) {
    %c0_i32 = arith.constant 0 : i32
    %c0_i32_0 = arith.constant 0 : i32
    %c0_i32_1 = arith.constant 0 : i32
    return %arg0, %c0_i32, %c0_i32_0 : i32, i32, i32
  }
  func.func @transform_3(%arg0: i32) -> (i32, i32, i32) {
    %c0_i32 = arith.constant 0 : i32
    %c0_i32_0 = arith.constant 0 : i32
    %c0_i32_1 = arith.constant 0 : i32
    return %arg0, %c0_i32, %c0_i32_0 : i32, i32, i32
  }
  func.func @transform_4(%arg0: i32) -> (i32, i32, i32) {
    %c0_i32 = arith.constant 0 : i32
    %c0_i32_0 = arith.constant 0 : i32
    %c0_i32_1 = arith.constant 0 : i32
    return %arg0, %c0_i32, %c0_i32_0 : i32, i32, i32
  }
}

</mosaic_0001>

<bundles_post_ra>
// kernel: tpu_custom_call.1
= control target key start
LH: loop header
LB: loop body
LE: loop exit
PB: predicated region body
PF: predicated region fallthrough
CT: control target
= control target key end

     0   :  { %10 = vsyncpa [#allocation3], 0  ;;  %s502_s0 = inlined_call_operand.hbm [shape: f32[2,8,32], index: 0, kind: input, shape index: {}]   ;;  %s503_s1 = inlined_call_operand.hbm [shape: f32[2,8,32], index: 1, kind: input, shape index: {}]   ;;  %s504_s2 = inlined_call_operand.hbm [shape: f32[2,8,32], index: 2, kind: input, shape index: {}]   ;;  %s505_s3 = inlined_call_operand.hbm [shape: f32[2,8,32], index: 3, kind: output, shape index: {0}]   ;;  %s506_s4 = inlined_call_operand.hbm [shape: f32[2,8,8], index: 4, kind: output, shape index: {1}]  }
   0x1   :  { %11 = vsyncpa [#allocation6], 0 }
   0x2   :  { %12 = vsyncpa [#allocation4], 0 }
   0x3   :  { %13 = vsyncpa [#allocation10], 0  ;;  %s31_s17 = sshll.u32 %s503_s1, 4  ;;  %s426_s18 = smov [#allocation5]   ;;  %s32_s17 = int_to_ptr.hbm [resolvable:$true] %s31_s17 }
   0x4   :  { %s33_s19 = sshll.u32 %s426_s18, 4  ;;  %s18_s22 = sshll.u32 %s502_s0, 4  ;;  %s34_s19 = int_to_ptr.vmem [resolvable:$true] %s33_s19  ;;  %s19_s22 = int_to_ptr.hbm [resolvable:$true] %s18_s22 }
   0x5   :  { %s427_s23 = smov 128   ;;  %s428_s24 = smov 8  }
   0x6   :  { %39 = dma.hbm_to_vmem [thread:$0]  %s32_s17, 256, %s34_s19, [#allocation6], %s427_s23, %s427_s23, %s428_s24  }
   0x7   :  { %s429_s25 = smov [#allocation2]   ;;  %s44_s1 = sshll.u32 %s504_s2, 4  ;;  %s45_s1 = int_to_ptr.hbm [resolvable:$true] %s44_s1 }
   0x8   :  { %s20_s26 = sshll.u32 %s429_s25, 4  ;;  %s430_s0 = smov [#allocation7]   ;;  %s21_s26 = int_to_ptr.vmem [resolvable:$true] %s20_s26 }
   0x9   :  { %26 = dma.hbm_to_vmem [thread:$0]  %s19_s22, 256, %s21_s26, [#allocation3], %s427_s23, %s427_s23, %s428_s24  }
   0xa   :  { %s46_s29 = sshll.u32 %s430_s0, 4  ;;  %s47_s29 = int_to_ptr.vmem [resolvable:$true] %s46_s29 }
   0xb   :  { %52 = dma.hbm_to_vmem [thread:$0]  %s45_s1, 256, %s47_s29, [#allocation6], %s427_s23, %s427_s23, %s428_s24  }
   0xc   :  { %418 = dma.done.wait [#allocation3], 256  }
   0xd   :  { %419 = vsyncadd [#allocation3], 4294967040 }
   0xe   :  { %420 = dma.done.wait [#allocation6], 512  }
   0xf   :  { %421 = vsyncadd [#allocation6], 4294966784  ;;  %vm69_vm0 = vcmask 261120   ;;  %v67_v0 = vld [vmem:[#allocation5] sm:$0xff]  ;;  %v68_v1 = vld [vmem:[#allocation5 + $0x8] sm:$0xff]  ;;  %vm122_vm1 = vcmask 64512  }
  0x10   :  { %277 = vmatpush.xpose.msk.msra.mxu0 %vm69_vm0, %v67_v0  ;;  %279 = vmatpush.xpose.msk.msra.mxu1 %vm69_vm0, %v68_v1  ;;  %v65_v2 = vld [vmem:[#allocation2] sm:$0xff]  ;;  %v66_v3 = vld [vmem:[#allocation2 + $0x8] sm:$0xff]  ;;  %s431_s2 = smov [#allocation9]   ;;  %s258_s7 = sshll.u32 %s506_s4, 4  ;;  %s259_s7 = int_to_ptr.hbm [resolvable:$true] %s258_s7 }
  0x11   :  { %v189_v14 = vld [vmem:[#allocation7] sm:$0xff]  ;;  %v190_v15 = vld [vmem:[#allocation7 + $0x8] sm:$0xff]  ;;  %s256_s30 = sshll.u32 %s431_s2, 4  ;;  %s432_s8 = smov [#allocation8]   ;;  %s257_s30 = int_to_ptr.vmem [resolvable:$true] %s256_s30 }
  0x12   :  { %209 = vmatpush.msra.mxu2 %v189_v14  ;;  %232 = vmatpush.msra.mxu3 %v190_v15  ;;  %s243_s9 = sshll.u32 %s432_s8, 4  ;;  %s245_s12 = sshll.u32 %s505_s3, 4  ;;  %s244_s9 = int_to_ptr.vmem [resolvable:$true] %s243_s9  ;;  %s246_s12 = int_to_ptr.hbm [resolvable:$true] %s245_s12 }
  0x13   :  { %278 = vmatmul.msk.f32.vlgmr.msra.gmra.mxu0 %vm69_vm0, %v65_v2  ;;  %280 = vmatmul.msk.f32.vlgmr.msra.gmra.mxu1 %vm69_vm0, %v66_v3 }
  0x90   :  { %v93_v4 = vpop.f32.mrf.mxu0  ;;  %v119_v5 = vpop.f32.mrf.mxu1 }
  0x91   :  { %v123_v6 = vsel %vm122_vm1, %v93_v4, -inf  ;;  %v130_v7 = vsel %vm122_vm1, %v119_v5, -inf }
  0x92   :  { %v124_v8 = vrot.slane %v123_v6, 4  ;;  %v131_v9 = vrot.slane %v130_v7, 4 }
  0x94   :  { %v125_v10 = vmax.f32 %v123_v6, %v124_v8  ;;  %v132_v11 = vmax.f32 %v130_v7, %v131_v9 }
  0x96   :  { %v126_v12 = vrot.slane %v125_v10, 2  ;;  %v133_v13 = vrot.slane %v132_v11, 2 }
  0x98   :  { %v127_v16 = vmax.f32 %v125_v10, %v126_v12  ;;  %v134_v17 = vmax.f32 %v132_v11, %v133_v13 }
  0x9a   :  { %v128_v18 = vrot.slane %v127_v16, 1  ;;  %v135_v19 = vrot.slane %v134_v17, 1 }
  0x9c   :  { %v129_v20 = vmax.f32 %v127_v16, %v128_v18  ;;  %v136_v21 = vmax.f32 %v134_v17, %v135_v19 }
  0x9e   :  { %v137_v22 = vsub.f32 %v93_v4, %v129_v20  ;;  %v138_v23 = vsub.f32 %v119_v5, %v136_v21 }
  0xa0   :  { %v139_v24 = vmul.f32 1.442695, %v137_v22  ;;  %v141_v25 = vmul.f32 1.442695, %v138_v23 }
  0xa2   :  { %290 = vpow2.f32 %v139_v24 }
  0xa3   :  { %292 = vpow2.f32 %v141_v25 }
  0xa8   :  { %v291_v26 = vpop.eup %290 }
  0xa9   :  { %v293_v27 = vpop.eup %292  ;;  %v143_v28 = vsel %vm122_vm1, %v291_v26, 0.0 }
  0xaa   :  { %v144_v29 = vrot.slane %v143_v28, 4  ;;  %v150_v30 = vsel %vm122_vm1, %v293_v27, 0.0 }
  0xab   :  { %v151_v31 = vrot.slane %v150_v30, 4 }
  0xac   :  { %v145_v32 = vadd.f32 %v144_v29, %v143_v28 }
  0xad   :  { %v152_v33 = vadd.f32 %v151_v31, %v150_v30 }
  0xae   :  { %v146_v34 = vrot.slane %v145_v32, 2 }
  0xaf   :  { %v153_v35 = vrot.slane %v152_v33, 2 }
  0xb0   :  { %v147_v36 = vadd.f32 %v146_v34, %v145_v32 }
  0xb1   :  { %v154_v37 = vadd.f32 %v153_v35, %v152_v33 }
  0xb2   :  { %v148_v38 = vrot.slane %v147_v36, 1 }
  0xb3   :  { %v155_v39 = vrot.slane %v154_v37, 1 }
  0xb4   :  { %v149_v40 = vadd.f32 %v148_v38, %v147_v36 }
  0xb5   :  { %v156_v41 = vadd.f32 %v155_v39, %v154_v37 }
  0xb6   :  { %294 = vrcp.f32 %v149_v40  ;;  %v168_v47 = vand.u32 2147483648, %v149_v40  ;;  %v166_v50 = vand.u32 2147483647, %v149_v40  ;;  %vm162_vm4 = vweird.f32 %v149_v40 }
  0xb7   :  { %296 = vrcp.f32 %v156_v41  ;;  %v182_v51 = vand.u32 2147483648, %v156_v41  ;;  %v180_v53 = vand.u32 2147483647, %v156_v41  ;;  %vm176_vm6 = vweird.f32 %v156_v41 }
  0xb8   :  { %v169_v55 = vor.u32 1.1754944e-38, %v168_v47  ;;  %vm167_vm7 = vcmp.eq.f32.partialorder %v166_v50, 8.507059e+37 }
  0xb9   :  { %v183_v58 = vor.u32 1.1754944e-38, %v182_v51  ;;  %vm181_vm9 = vcmp.eq.f32.partialorder %v180_v53, 8.507059e+37 }
  0xbc   :  { %v295_v42 = vpop.eup %294 }
  0xbd   :  { %v297_v43 = vpop.eup %296  ;;  %v158_v44 = vmul.f32 %v295_v42, %v149_v40  ;;  %vm163_vm2 = vweird.f32 %v295_v42 }
  0xbe   :  { %v172_v45 = vmul.f32 %v297_v43, %v156_v41  ;;  %vm177_vm3 = vweird.f32 %v297_v43  ;;  %vm164_vm5 = vmor %vm162_vm4, %vm163_vm2 }
  0xbf   :  { %v159_v46 = vsub.f32 1.0, %v158_v44  ;;  %vm178_vm8 = vmor %vm176_vm6, %vm177_vm3 }
  0xc0   :  { %v173_v48 = vsub.f32 1.0, %v172_v45 }
  0xc1   :  { %v160_v49 = vmul.f32 %v295_v42, %v159_v46 }
  0xc2   :  { %v174_v52 = vmul.f32 %v297_v43, %v173_v48 }
  0xc3   :  { %v161_v54 = vadd.f32 %v295_v42, %v160_v49 }
  0xc4   :  { %v175_v56 = vadd.f32 %v297_v43, %v174_v52 }
  0xc5   :  { %v165_v57 = vsel %vm164_vm5, %v295_v42, %v161_v54 }
  0xc6   :  { %v170_v59 = vsel %vm167_vm7, %v169_v55, %v165_v57  ;;  %v179_v60 = vsel %vm178_vm8, %v297_v43, %v175_v56 }
  0xc7   :  { %v185_v61 = vmul.f32 %v291_v26, %v170_v59  ;;  %v184_v62 = vsel %vm181_vm9, %v183_v58, %v179_v60 }
  0xc8   :  { %v186_v63 = vmul.f32 %v293_v27, %v184_v62 }
  0xc9   :  { %281 = vmatmul.msk.f32.vlgmr.msra.gmra.mxu2 %vm122_vm1, %v185_v61  ;;  %187 = vst.msk [vmem:[#allocation9] sm:$0xff] %vm122_vm1, %v185_v61 }
  0xca   :  { %282 = vmatmul.msk.f32.vlgmr.msra.gmra.mxu3 %vm122_vm1, %v186_v63  ;;  %188 = vst.msk [vmem:[#allocation9 + $0x8] sm:$0xff] %vm122_vm1, %v186_v63 }
  0xcb   :  { %264 = dma.vmem_to_hbm [thread:$0]  %s257_s30, 256, %s259_s7, [#allocation10], %s427_s23, %s427_s23, %s428_s24  }
 0x14c   :  { %v211_v0 = vpop.f32.mrf.mxu2 }
 0x14d   :  { %237 = vst.msk [vmem:[#allocation8] sm:$0xff] %vm69_vm0, %v211_v0  ;;  %v234_v1 = vpop.f32.mrf.mxu3 }
 0x14e   :  { %238 = vst.msk [vmem:[#allocation8 + $0x8] sm:$0xff] %vm69_vm0, %v234_v1 }
 0x14f   :  { %251 = dma.vmem_to_hbm [thread:$0]  %s244_s9, 256, %s246_s12, [#allocation4], %s427_s23, %s427_s23, %s428_s24  }
 0x150   :  { %422 = dma.done.wait [#allocation4], 256  }
 0x151   :  { %423 = vsyncadd [#allocation4], 4294967040 }
 0x152   :  { %424 = dma.done.wait [#allocation10], 256  }
 0x153   :  { %425 = vsyncadd [#allocation10], 4294967040 }
 0x154   :  { %273 = vsyncpa [#allocation3], 1 }
 0x155   :  { %274 = vsyncpa [#allocation6], 1 }
 0x156   :  { %275 = vsyncpa [#allocation4], 1 }
 0x157   :  { %276 = vsyncpa [#allocation10], 1 }

</bundles_post_ra>
